<compile_context>
chip_gen: v5e
topology: v5e:2x2
jax: 0.10.0
libtpu: 0.0.40
codegen_flags: <defaults>
</compile_context>

<pallas_src>
import jax
import jax.numpy as jnp
from jax.experimental import pallas as pl
from jax.experimental.pallas import tpu as pltpu


def _round_up(x, m):
    return (x + m - 1) // m * m


def _transition_tile_kernel(x_ref, w_ref, pool_ref, sum_ref, ssq_ref):
    """One M-tile of conv1x1 -> ReLU -> pooled tap-sum + BN partial statistics.

    x_ref   : (4, TILE_M, Cin) bf16  rows of the four 2x2 pooling-window taps
    w_ref   : (Cin, Cout)      bf16  1x1 conv weight (resident across the grid)
    pool_ref: (TILE_M, Cout)   f32   sum of the four relu'd taps (= pooled * 4)
    sum_ref : (1, 1, Cout)     f32   per-tile sum of relu'd conv outputs
    ssq_ref : (1, 1, Cout)     f32   per-tile sum of squares of relu'd conv outputs
    """
    w = w_ref[...]
    pool = None
    ssq = None
    for t in range(4):  # static unroll over the 2x2 pooling-window taps
        y = jnp.dot(x_ref[t], w, preferred_element_type=jnp.float32)  # MXU, f32 acc
        y = jnp.maximum(y, 0.0)                                       # ReLU (pre-pool)
        pool = y if pool is None else pool + y
        s = jnp.sum(y * y, axis=0, keepdims=True)
        ssq = s if ssq is None else ssq + s
    pool_ref[...] = pool
    # sum over all conv outputs of this tile == row-sum of the tap-summed tile.
    sum_ref[...] = jnp.sum(pool, axis=0, keepdims=True)[None]
    ssq_ref[...] = ssq[None]


def transition_layer_forward(x_nchw, params, eps=1e-5, tile_m=512):
    """External semantics match the PyTorch module: NCHW in -> NCHW out."""
    w = params["w"]                                   # (Cout, Cin) == (Cout, Cin, 1, 1) squeezed
    gamma = params["gamma"].astype(jnp.float32)
    beta = params["beta"].astype(jnp.float32)
    N, Cin, H, W = x_nchw.shape
    Cout = w.shape[0]
    assert H % 2 == 0 and W % 2 == 0, "AvgPool2d(2,2) tiling assumes even H, W"
    Hp, Wp = H // 2, W // 2
    M2 = N * Hp * Wp

    # Single fused relayout: NCHW -> (tap, n*hp*wp, Cin), tap = dh*2 + dw of the
    # 2x2 pooling window. One HBM pass; bf16 for the MXU and half the DMA bytes.
    xr = (x_nchw.reshape(N, Cin, Hp, 2, Wp, 2)
                .transpose(3, 5, 0, 2, 4, 1)
                .reshape(4, M2, Cin)
                .astype(jnp.bfloat16))
    wt = jnp.transpose(w).astype(jnp.bfloat16)        # (Cin, Cout)

    # Row tiling: multiple of 16 (bf16 sublane tile); pad rows with zeros.
    tile_m = max(16, min(tile_m, _round_up(M2, 16)))
    assert tile_m % 16 == 0
    m2p = _round_up(M2, tile_m)
    if m2p != M2:
        xr = jnp.pad(xr, ((0, 0), (0, m2p - M2), (0, 0)))
    num_tiles = m2p // tile_m

    pool_sum, sums, ssqs = pl.pallas_call(
        _transition_tile_kernel,
        out_shape=(
            jax.ShapeDtypeStruct((m2p, Cout), jnp.float32),            # pooled tap-sum
            jax.ShapeDtypeStruct((num_tiles, 1, Cout), jnp.float32),   # per-tile sum
            jax.ShapeDtypeStruct((num_tiles, 1, Cout), jnp.float32),   # per-tile sumsq
        ),
        grid_spec=pltpu.PrefetchScalarGridSpec(
            num_scalar_prefetch=0,
            grid=(num_tiles,),
            in_specs=[
                pl.BlockSpec((4, tile_m, Cin), lambda i: (0, i, 0)),   # pixel tile (4 taps)
                pl.BlockSpec((Cin, Cout), lambda i: (0, 0)),           # conv weight
            ],
            out_specs=(
                pl.BlockSpec((tile_m, Cout), lambda i: (i, 0)),
                pl.BlockSpec((1, 1, Cout), lambda i: (i, 0, 0)),
                pl.BlockSpec((1, 1, Cout), lambda i: (i, 0, 0)),
            ),
        ),
        compiler_params=pltpu.CompilerParams(
            dimension_semantics=("parallel",),    # disjoint tiles -> megacore-shardable
        ),
    )(xr, wt)

    # Tiny per-channel reduction + BN affine (pooling 1/4 folded into the scale),
    # applied to the 4x-smaller pooled slab; left to XLA to fuse.
    cnt = 4.0 * M2                                        # true pixel count (ignores padding)
    mean = jnp.sum(sums, axis=(0, 1)) / cnt
    var = jnp.sum(ssqs, axis=(0, 1)) / cnt - mean * mean  # biased (train-mode) variance
    inv = gamma * jax.lax.rsqrt(var + eps)
    scale = 0.25 * inv                                     # pooling factor folded in
    shift = beta - mean * inv
    out2d = pool_sum[:M2] * scale + shift                  # (M2, Cout)
    out = out2d.reshape(N, Hp, Wp, Cout)                   # rows ordered (n, h/2, w/2)
    return jnp.transpose(out, (0, 3, 1, 2))                # NCHW


def reference_forward(x_nchw, params, eps=1e-5):
    """Pure-JAX reference with matched (bf16-operand, f32-accumulate) conv precision."""
    x = jnp.transpose(x_nchw, (0, 2, 3, 1)).astype(jnp.bfloat16)      # NHWC
    w = jnp.transpose(params["w"]).astype(jnp.bfloat16)               # (Cin, Cout)
    y = jax.nn.relu(jnp.einsum("nhwc,cd->nhwd", x, w,
                               preferred_element_type=jnp.float32))
    mean = jnp.mean(y, axis=(0, 1, 2))
    var = jnp.mean((y - mean) ** 2, axis=(0, 1, 2))                   # biased (train mode)
    bn = (y - mean) * jax.lax.rsqrt(var + eps) * params["gamma"] + params["beta"]
    pooled = jax.lax.reduce_window(bn, 0.0, jax.lax.add,
                                   (1, 2, 2, 1), (1, 2, 2, 1), "VALID") * 0.25
    return jnp.transpose(pooled, (0, 3, 1, 2))                        # NCHW


if __name__ == "__main__":
    N, Cin, Cout, H, W = 2, 8, 4, 16, 16

    key = jax.random.PRNGKey(0)
    k = jax.random.split(key, 4)
    x = jax.random.normal(k[0], (N, Cin, H, W), jnp.float32)
    params = {
        # Conv2d(in=Cin, out=Cout, kernel_size=1, bias=False) weight, stored (Cout, Cin)
        "w": 0.3 * jax.random.normal(k[1], (Cout, Cin), jnp.float32),
        # BatchNorm2d affine params (deterministic synthetic init)
        "gamma": jax.random.uniform(k[2], (Cout,), jnp.float32, 0.5, 1.5),
        "beta": 0.1 * jax.random.normal(k[3], (Cout,), jnp.float32),
    }

    ref = jax.block_until_ready(reference_forward(x, params))

    # Default tile (single grid step at this toy size) and a forced multi-tile
    # run (4 grid steps) to exercise the tiled-statistics path.
    for tm in (512, 32):
        out = jax.block_until_ready(transition_layer_forward(x, params, tile_m=tm))
        assert out.shape == (N, Cout, H // 2, W // 2), out.shape
        max_err = float(jnp.max(jnp.abs(out - ref)))
        assert max_err < 2e-3, f"tile_m={tm}: mismatch vs reference: {max_err}"

    print("KERNEL_OK")
</pallas_src>

<mosaic_0001>
module attributes {stable_mosaic.version = 11 : i64} {
  func.func @_transition_tile_kernel(%arg0: i32, %arg1: memref<4x128x8xbf16, #tpu.memory_space<vmem>>, %arg2: memref<8x4xbf16, #tpu.memory_space<vmem>>, %arg3: memref<128x4xf32, #tpu.memory_space<vmem>>, %arg4: memref<1x1x4xf32, #tpu.memory_space<vmem>>, %arg5: memref<1x1x4xf32, #tpu.memory_space<vmem>>) attributes {dimension_semantics = [#tpu.dimension_semantics<parallel>], iteration_bounds = array<i64: 1>, scalar_prefetch = 0 : i64, scratch_operands = 0 : i64, tpu.core_type = #tpu.core_type<tc>, window_params = [{transform_indices = @transform_0, window_bounds = array<i64: 4, 128, 8>}, {pipeline_mode = #tpu.pipeline_mode<synchronous>, transform_indices = @transform_1, window_bounds = array<i64: 8, 4>}, {transform_indices = @transform_2, window_bounds = array<i64: 128, 4>}, {transform_indices = @transform_3, window_bounds = array<i64: 1, 1, 4>}, {transform_indices = @transform_4, window_bounds = array<i64: 1, 1, 4>}]} {
    %c0 = arith.constant 0 : index
    %c0_0 = arith.constant 0 : index
    %0 = vector.load %arg2[%c0, %c0_0] : memref<8x4xbf16, #tpu.memory_space<vmem>>, vector<8x4xbf16>
    %c0_1 = arith.constant 0 : index
    %c0_2 = arith.constant 0 : index
    %c0_3 = arith.constant 0 : index
    %1 = vector.load %arg1[%c0_1, %c0_2, %c0_3] : memref<4x128x8xbf16, #tpu.memory_space<vmem>>, vector<1x128x8xbf16>
    %2 = vector.shape_cast %1 : vector<1x128x8xbf16> to vector<128x8xbf16>
    %cst = arith.constant dense<0.000000e+00> : vector<128x4xf32>
    %3 = tpu.matmul %2, %0, %cst {dimension_numbers = #tpu.dot_dimension_numbers<[1], [0], [0], [1], [0, 0, 1, 1], [], []>} : vector<128x8xbf16>, vector<8x4xbf16>, vector<128x4xf32> -> vector<128x4xf32>
    %cst_4 = arith.constant 0.000000e+00 : f32
    %4 = vector.broadcast %cst_4 : f32 to vector<128x4xf32>
    %5 = arith.maximumf %3, %4 : vector<128x4xf32>
    %6 = arith.mulf %5, %5 : vector<128x4xf32>
    %cst_5 = arith.constant dense<0.000000e+00> : vector<4xf32>
    %7 = vector.multi_reduction <add>, %6, %cst_5 [0] : vector<128x4xf32> to vector<4xf32>
    %8 = vector.shape_cast %7 : vector<4xf32> to vector<1x4xf32>
    %c1 = arith.constant 1 : index
    %c0_6 = arith.constant 0 : index
    %c0_7 = arith.constant 0 : index
    %9 = vector.load %arg1[%c1, %c0_6, %c0_7] : memref<4x128x8xbf16, #tpu.memory_space<vmem>>, vector<1x128x8xbf16>
    %10 = vector.shape_cast %9 : vector<1x128x8xbf16> to vector<128x8xbf16>
    %cst_8 = arith.constant dense<0.000000e+00> : vector<128x4xf32>
    %11 = tpu.matmul %10, %0, %cst_8 {dimension_numbers = #tpu.dot_dimension_numbers<[1], [0], [0], [1], [0, 0, 1, 1], [], []>} : vector<128x8xbf16>, vector<8x4xbf16>, vector<128x4xf32> -> vector<128x4xf32>
    %cst_9 = arith.constant 0.000000e+00 : f32
    %12 = vector.broadcast %cst_9 : f32 to vector<128x4xf32>
    %13 = arith.maximumf %11, %12 : vector<128x4xf32>
    %14 = arith.addf %5, %13 : vector<128x4xf32>
    %15 = arith.mulf %13, %13 : vector<128x4xf32>
    %cst_10 = arith.constant dense<0.000000e+00> : vector<4xf32>
    %16 = vector.multi_reduction <add>, %15, %cst_10 [0] : vector<128x4xf32> to vector<4xf32>
    %17 = vector.shape_cast %16 : vector<4xf32> to vector<1x4xf32>
    %18 = arith.addf %8, %17 : vector<1x4xf32>
    %c2 = arith.constant 2 : index
    %c0_11 = arith.constant 0 : index
    %c0_12 = arith.constant 0 : index
    %19 = vector.load %arg1[%c2, %c0_11, %c0_12] : memref<4x128x8xbf16, #tpu.memory_space<vmem>>, vector<1x128x8xbf16>
    %20 = vector.shape_cast %19 : vector<1x128x8xbf16> to vector<128x8xbf16>
    %cst_13 = arith.constant dense<0.000000e+00> : vector<128x4xf32>
    %21 = tpu.matmul %20, %0, %cst_13 {dimension_numbers = #tpu.dot_dimension_numbers<[1], [0], [0], [1], [0, 0, 1, 1], [], []>} : vector<128x8xbf16>, vector<8x4xbf16>, vector<128x4xf32> -> vector<128x4xf32>
    %cst_14 = arith.constant 0.000000e+00 : f32
    %22 = vector.broadcast %cst_14 : f32 to vector<128x4xf32>
    %23 = arith.maximumf %21, %22 : vector<128x4xf32>
    %24 = arith.addf %14, %23 : vector<128x4xf32>
    %25 = arith.mulf %23, %23 : vector<128x4xf32>
    %cst_15 = arith.constant dense<0.000000e+00> : vector<4xf32>
    %26 = vector.multi_reduction <add>, %25, %cst_15 [0] : vector<128x4xf32> to vector<4xf32>
    %27 = vector.shape_cast %26 : vector<4xf32> to vector<1x4xf32>
    %28 = arith.addf %18, %27 : vector<1x4xf32>
    %c3 = arith.constant 3 : index
    %c0_16 = arith.constant 0 : index
    %c0_17 = arith.constant 0 : index
    %29 = vector.load %arg1[%c3, %c0_16, %c0_17] : memref<4x128x8xbf16, #tpu.memory_space<vmem>>, vector<1x128x8xbf16>
    %30 = vector.shape_cast %29 : vector<1x128x8xbf16> to vector<128x8xbf16>
    %cst_18 = arith.constant dense<0.000000e+00> : vector<128x4xf32>
    %31 = tpu.matmul %30, %0, %cst_18 {dimension_numbers = #tpu.dot_dimension_numbers<[1], [0], [0], [1], [0, 0, 1, 1], [], []>} : vector<128x8xbf16>, vector<8x4xbf16>, vector<128x4xf32> -> vector<128x4xf32>
    %cst_19 = arith.constant 0.000000e+00 : f32
    %32 = vector.broadcast %cst_19 : f32 to vector<128x4xf32>
    %33 = arith.maximumf %31, %32 : vector<128x4xf32>
    %34 = arith.addf %24, %33 : vector<128x4xf32>
    %35 = arith.mulf %33, %33 : vector<128x4xf32>
    %cst_20 = arith.constant dense<0.000000e+00> : vector<4xf32>
    %36 = vector.multi_reduction <add>, %35, %cst_20 [0] : vector<128x4xf32> to vector<4xf32>
    %37 = vector.shape_cast %36 : vector<4xf32> to vector<1x4xf32>
    %38 = arith.addf %28, %37 : vector<1x4xf32>
    %c0_21 = arith.constant 0 : index
    %c0_22 = arith.constant 0 : index
    %39 = vector.load %arg3[%c0_21, %c0_22] : memref<128x4xf32, #tpu.memory_space<vmem>>, vector<128x4xf32>
    tpu.vector_store %arg3[%c0_21, %c0_22], %34 {strides = array<i32>} : memref<128x4xf32, #tpu.memory_space<vmem>>, vector<128x4xf32>,
    %cst_23 = arith.constant dense<0.000000e+00> : vector<4xf32>
    %40 = vector.multi_reduction <add>, %34, %cst_23 [0] : vector<128x4xf32> to vector<4xf32>
    %41 = vector.shape_cast %40 : vector<4xf32> to vector<1x4xf32>
    %42 = vector.shape_cast %41 : vector<1x4xf32> to vector<1x1x4xf32>
    %c0_24 = arith.constant 0 : index
    %c0_25 = arith.constant 0 : index
    %c0_26 = arith.constant 0 : index
    %43 = vector.load %arg4[%c0_24, %c0_25, %c0_26] : memref<1x1x4xf32, #tpu.memory_space<vmem>>, vector<1x1x4xf32>
    tpu.vector_store %arg4[%c0_24, %c0_25, %c0_26], %42 {strides = array<i32>} : memref<1x1x4xf32, #tpu.memory_space<vmem>>, vector<1x1x4xf32>,
    %44 = vector.shape_cast %38 : vector<1x4xf32> to vector<1x1x4xf32>
    %c0_27 = arith.constant 0 : index
    %c0_28 = arith.constant 0 : index
    %c0_29 = arith.constant 0 : index
    %45 = vector.load %arg5[%c0_27, %c0_28, %c0_29] : memref<1x1x4xf32, #tpu.memory_space<vmem>>, vector<1x1x4xf32>
    tpu.vector_store %arg5[%c0_27, %c0_28, %c0_29], %44 {strides = array<i32>} : memref<1x1x4xf32, #tpu.memory_space<vmem>>, vector<1x1x4xf32>,
    return
  }
  func.func @transform_0(%arg0: i32) -> (i32, i32, i32) {
    %c0_i32 = arith.constant 0 : i32
    %c0_i32_0 = arith.constant 0 : i32
    %c0_i32_1 = arith.constant 0 : i32
    return %c0_i32, %arg0, %c0_i32_0 : i32, i32, i32
  }
  func.func @transform_1(%arg0: i32) -> (i32, i32) {
    %c0_i32 = arith.constant 0 : i32
    %c0_i32_0 = arith.constant 0 : i32
    %c0_i32_1 = arith.constant 0 : i32
    return %c0_i32, %c0_i32_0 : i32, i32
  }
  func.func @transform_2(%arg0: i32) -> (i32, i32) {
    %c0_i32 = arith.constant 0 : i32
    %c0_i32_0 = arith.constant 0 : i32
    return %arg0, %c0_i32 : i32, i32
  }
  func.func @transform_3(%arg0: i32) -> (i32, i32, i32) {
    %c0_i32 = arith.constant 0 : i32
    %c0_i32_0 = arith.constant 0 : i32
    %c0_i32_1 = arith.constant 0 : i32
    return %arg0, %c0_i32, %c0_i32_0 : i32, i32, i32
  }
  func.func @transform_4(%arg0: i32) -> (i32, i32, i32) {
    %c0_i32 = arith.constant 0 : i32
    %c0_i32_0 = arith.constant 0 : i32
    %c0_i32_1 = arith.constant 0 : i32
    return %arg0, %c0_i32, %c0_i32_0 : i32, i32, i32
  }
}

</mosaic_0001>

<bundles_post_ra>
// kernel: tpu_custom_call.1
= control target key start
LH: loop header
LB: loop body
LE: loop exit
PB: predicated region body
PF: predicated region fallthrough
CT: control target
= control target key end

     0   :  { %10 = vsyncpa [#allocation3], 0  ;;  %vm99_vm0 = vcmask 1043456   ;;  %vm74_vm1 = vcmask 64512   ;;  %s1681_s0 = inlined_call_operand.vmem [shape: bf16[4,128,8], index: 0, kind: input, shape index: {}]   ;;  %s1682_s1 = inlined_call_operand.vmem [shape: bf16[8,4], index: 1, kind: input, shape index: {}]   ;;  %s1683_s2 = inlined_call_operand.vmem [shape: f32[128,4], index: 2, kind: output, shape index: {0}]   ;;  %s1684_s3 = inlined_call_operand.hbm [shape: f32[1,1,4], index: 3, kind: output, shape index: {1}]   ;;  %s1685_s4 = inlined_call_operand.hbm [shape: f32[1,1,4], index: 4, kind: output, shape index: {2}]  }
   0x1   :  { %v17_v0 = vld [vmem:[%s1682_s1] sm:$0xf] }
   0x2   :  { %v101_v1 = vsel %vm99_vm0, %v17_v0, 0  ;;  %v1170_v2 = vld [vmem:[%s1681_s0] sm:$0xff] }
   0x3   :  { %v1178_v3 = vld [vmem:[%s1681_s0 + $0x40] sm:$0xff]  ;;  %110 = vmatpush.bf16.msra.mxu0 %v101_v1  ;;  %310 = vmatpush.bf16.msra.mxu1 %v101_v1 }
   0x4   :  { %v1186_v4 = vld [vmem:[%s1681_s0 + $0x80] sm:$0xff]  ;;  %526 = vmatpush.bf16.msra.mxu2 %v101_v1  ;;  %742 = vmatpush.bf16.msra.mxu3 %v101_v1 }
   0x5   :  { %v1194_v5 = vld [vmem:[%s1681_s0 + $0xc0] sm:$0xff] }
   0x6   :  { %11 = vsyncpa [#allocation5], 0  ;;  %994 = vmatmul.msk.bf16.vlgmr.msra.gmra.mxu0 %vm74_vm1, %v1170_v2  ;;  %1050 = vmatmul.msk.bf16.vlgmr.msra.gmra.mxu1 %vm74_vm1, %v1178_v3  ;;  %v1171_v6 = vld [vmem:[%s1681_s0 + $0x8] sm:$0xff]  ;;  %v1172_v10 = vld [vmem:[%s1681_s0 + $0x10] sm:$0xff]  ;;  %vm184_vm2 = vcmask 31744   ;;  %s935_s6 = sshll.u32 %s1684_s3, 4  ;;  %s936_s6 = int_to_ptr.hbm [resolvable:$true] %s935_s6 }
   0x7   :  { %1106 = vmatmul.msk.bf16.vlgmr.msra.gmra.mxu2 %vm74_vm1, %v1186_v4  ;;  %1162 = vmatmul.msk.bf16.vlgmr.msra.gmra.mxu3 %vm74_vm1, %v1194_v5  ;;  %v1179_v7 = vld [vmem:[%s1681_s0 + $0x48] sm:$0xff]  ;;  %v1180_v11 = vld [vmem:[%s1681_s0 + $0x50] sm:$0xff]  ;;  %v1173_v14 = vld [vmem:[%s1681_s0 + $0x18] sm:$0xff]  ;;  %vm923_vm3 = vcmask 24576   ;;  %s1257_s7 = smov [#allocation4]   ;;  %s946_s11 = sshll.u32 %s1685_s4, 4  ;;  %s947_s11 = int_to_ptr.hbm [resolvable:$true] %s946_s11 }
   0x8   :  { %v1187_v8 = vld [vmem:[%s1681_s0 + $0x88] sm:$0xff]  ;;  %v1188_v12 = vld [vmem:[%s1681_s0 + $0x90] sm:$0xff]  ;;  %v1181_v15 = vld [vmem:[%s1681_s0 + $0x58] sm:$0xff]  ;;  %s944_s8 = sshll.u32 %s1257_s7, 4  ;;  %s945_s8 = int_to_ptr.vmem [resolvable:$true] %s944_s8 }
   0x9   :  { %v1195_v9 = vld [vmem:[%s1681_s0 + $0xc8] sm:$0xff]  ;;  %v1196_v13 = vld [vmem:[%s1681_s0 + $0xd0] sm:$0xff]  ;;  %v1189_v16 = vld [vmem:[%s1681_s0 + $0x98] sm:$0xff] }
   0xa   :  { %v1197_v17 = vld [vmem:[%s1681_s0 + $0xd8] sm:$0xff]  ;;  %v1174_v18 = vld [vmem:[%s1681_s0 + $0x20] sm:$0xff]  ;;  %v1175_v22 = vld [vmem:[%s1681_s0 + $0x28] sm:$0xff] }
   0xb   :  { %v1182_v19 = vld [vmem:[%s1681_s0 + $0x60] sm:$0xff]  ;;  %v1183_v23 = vld [vmem:[%s1681_s0 + $0x68] sm:$0xff]  ;;  %v1176_v26 = vld [vmem:[%s1681_s0 + $0x30] sm:$0xff] }
   0xc   :  { %v1190_v20 = vld [vmem:[%s1681_s0 + $0xa0] sm:$0xff]  ;;  %v1191_v24 = vld [vmem:[%s1681_s0 + $0xa8] sm:$0xff]  ;;  %v1184_v27 = vld [vmem:[%s1681_s0 + $0x70] sm:$0xff] }
   0xd   :  { %v1198_v21 = vld [vmem:[%s1681_s0 + $0xe0] sm:$0xff]  ;;  %v1199_v25 = vld [vmem:[%s1681_s0 + $0xe8] sm:$0xff]  ;;  %v1192_v28 = vld [vmem:[%s1681_s0 + $0xb0] sm:$0xff] }
   0xe   :  { %v1200_v29 = vld [vmem:[%s1681_s0 + $0xf0] sm:$0xff]  ;;  %v1177_v30 = vld [vmem:[%s1681_s0 + $0x38] sm:$0xff] }
   0xf   :  { %v1185_v31 = vld [vmem:[%s1681_s0 + $0x78] sm:$0xff] }
  0x10   :  { %v1193_v32 = vld [vmem:[%s1681_s0 + $0xb8] sm:$0xff] }
  0x11   :  { %v1201_v33 = vld [vmem:[%s1681_s0 + $0xf8] sm:$0xff] }
  0x16   :  { %995 = vmatmul.msk.bf16.gmra.mxu0 %vm74_vm1, %v1171_v6  ;;  %1051 = vmatmul.msk.bf16.gmra.mxu1 %vm74_vm1, %v1179_v7 }
  0x17   :  { %1107 = vmatmul.msk.bf16.gmra.mxu2 %vm74_vm1, %v1187_v8  ;;  %1163 = vmatmul.msk.bf16.gmra.mxu3 %vm74_vm1, %v1195_v9 }
  0x26   :  { %996 = vmatmul.msk.bf16.gmra.mxu0 %vm74_vm1, %v1172_v10  ;;  %1052 = vmatmul.msk.bf16.gmra.mxu1 %vm74_vm1, %v1180_v11 }
  0x27   :  { %1108 = vmatmul.msk.bf16.gmra.mxu2 %vm74_vm1, %v1188_v12  ;;  %1164 = vmatmul.msk.bf16.gmra.mxu3 %vm74_vm1, %v1196_v13 }
  0x36   :  { %997 = vmatmul.msk.bf16.gmra.mxu0 %vm74_vm1, %v1173_v14  ;;  %1053 = vmatmul.msk.bf16.gmra.mxu1 %vm74_vm1, %v1181_v15 }
  0x37   :  { %1109 = vmatmul.msk.bf16.gmra.mxu2 %vm74_vm1, %v1189_v16  ;;  %1165 = vmatmul.msk.bf16.gmra.mxu3 %vm74_vm1, %v1197_v17 }
  0x46   :  { %998 = vmatmul.msk.bf16.gmra.mxu0 %vm74_vm1, %v1174_v18  ;;  %1054 = vmatmul.msk.bf16.gmra.mxu1 %vm74_vm1, %v1182_v19 }
  0x47   :  { %1110 = vmatmul.msk.bf16.gmra.mxu2 %vm74_vm1, %v1190_v20  ;;  %1166 = vmatmul.msk.bf16.gmra.mxu3 %vm74_vm1, %v1198_v21 }
  0x56   :  { %999 = vmatmul.msk.bf16.gmra.mxu0 %vm74_vm1, %v1175_v22  ;;  %1055 = vmatmul.msk.bf16.gmra.mxu1 %vm74_vm1, %v1183_v23 }
  0x57   :  { %1111 = vmatmul.msk.bf16.gmra.mxu2 %vm74_vm1, %v1191_v24  ;;  %1167 = vmatmul.msk.bf16.gmra.mxu3 %vm74_vm1, %v1199_v25 }
  0x66   :  { %1000 = vmatmul.msk.bf16.gmra.mxu0 %vm74_vm1, %v1176_v26  ;;  %1056 = vmatmul.msk.bf16.gmra.mxu1 %vm74_vm1, %v1184_v27 }
  0x67   :  { %1112 = vmatmul.msk.bf16.gmra.mxu2 %vm74_vm1, %v1192_v28  ;;  %1168 = vmatmul.msk.bf16.gmra.mxu3 %vm74_vm1, %v1200_v29 }
  0x76   :  { %1001 = vmatmul.msk.bf16.gmra.mxu0 %vm74_vm1, %v1177_v30  ;;  %1057 = vmatmul.msk.bf16.gmra.mxu1 %vm74_vm1, %v1185_v31 }
  0x77   :  { %1113 = vmatmul.msk.bf16.gmra.mxu2 %vm74_vm1, %v1193_v32  ;;  %1169 = vmatmul.msk.bf16.gmra.mxu3 %vm74_vm1, %v1201_v33 }
  0x83   :  { %v112_v34 = vpop.f32.mrf.mxu0  ;;  %v312_v35 = vpop.f32.mrf.mxu1 }
  0x84   :  { %v152_v36 = vmax.f32 %v112_v34, 0.0  ;;  %v352_v37 = vmax.f32 %v312_v35, 0.0 }
  0x86   :  { %v368_v38 = vadd.f32 %v352_v37, %v152_v36  ;;  %v168_v45 = vmul.f32 %v152_v36, %v152_v36  ;;  %v384_v46 = vmul.f32 %v352_v37, %v352_v37 }
  0x88   :  { %v185_v53 = vsel %vm184_vm2, %v168_v45, 0.0  ;;  %v400_v54 = vsel %vm184_vm2, %v384_v46, 0.0 }
  0x8a   :  { %v528_v39 = vpop.f32.mrf.mxu2  ;;  %v744_v40 = vpop.f32.mrf.mxu3 }
  0x8b   :  { %v568_v41 = vmax.f32 %v528_v39, 0.0  ;;  %v784_v42 = vmax.f32 %v744_v40, 0.0  ;;  %v114_v43 = vpop.f32.mrf.mxu0  ;;  %v314_v44 = vpop.f32.mrf.mxu1 }
  0x8c   :  { %v153_v47 = vmax.f32 %v114_v43, 0.0  ;;  %v353_v48 = vmax.f32 %v314_v44, 0.0 }
  0x8d   :  { %v584_v49 = vadd.f32 %v568_v41, %v368_v38  ;;  %v600_v59 = vmul.f32 %v568_v41, %v568_v41  ;;  %v816_v60 = vmul.f32 %v784_v42, %v784_v42 }
  0x8e   :  { %v169_v50 = vmul.f32 %v153_v47, %v153_v47  ;;  %v385_v51 = vmul.f32 %v353_v48, %v353_v48  ;;  %v369_v63 = vadd.f32 %v353_v48, %v153_v47 }
  0x8f   :  { %v800_v52 = vadd.f32 %v784_v42, %v584_v49  ;;  %v616_v9 = vsel %vm184_vm2, %v600_v59, 0.0  ;;  %v832_v10 = vsel %vm184_vm2, %v816_v60, 0.0 }
  0x90   :  { %v186_v55 = vsel %vm184_vm2, %v169_v50, 0.0  ;;  %v401_v56 = vsel %vm184_vm2, %v385_v51, 0.0 }
  0x91   :  { %870 = vst.msk [vmem:[%s1683_s2] sm:$0xff] %vm184_vm2, %v800_v52  ;;  %v187_v57 = vadd.f32 %v186_v55, %v185_v53  ;;  %v402_v58 = vadd.f32 %v401_v56, %v400_v54  ;;  %v886_v13 = vsel %vm184_vm2, %v800_v52, 0.0 }
  0x92   :  { %v530_v61 = vpop.f32.mrf.mxu2  ;;  %v746_v62 = vpop.f32.mrf.mxu3 }
  0x93   :  { %v569_v0 = vmax.f32 %v530_v61, 0.0  ;;  %v785_v1 = vmax.f32 %v746_v62, 0.0  ;;  %v117_v2 = vpop.f32.mrf.mxu0  ;;  %v317_v3 = vpop.f32.mrf.mxu1 }
  0x94   :  { %v154_v4 = vmax.f32 %v117_v2, 0.0  ;;  %v354_v5 = vmax.f32 %v317_v3, 0.0 }
  0x95   :  { %v585_v6 = vadd.f32 %v569_v0, %v369_v63  ;;  %v601_v7 = vmul.f32 %v569_v0, %v569_v0  ;;  %v817_v8 = vmul.f32 %v785_v1, %v785_v1 }
  0x96   :  { %v170_v11 = vmul.f32 %v154_v4, %v154_v4  ;;  %v386_v12 = vmul.f32 %v354_v5, %v354_v5  ;;  %v370_v23 = vadd.f32 %v354_v5, %v154_v4 }
  0x97   :  { %v617_v14 = vsel %vm184_vm2, %v601_v7, 0.0  ;;  %v801_v15 = vadd.f32 %v785_v1, %v585_v6  ;;  %v833_v16 = vsel %vm184_vm2, %v817_v8, 0.0 }
  0x98   :  { %v618_v17 = vadd.f32 %v617_v14, %v616_v9  ;;  %v834_v18 = vadd.f32 %v833_v16, %v832_v10  ;;  %v188_v19 = vsel %vm184_vm2, %v170_v11, 0.0  ;;  %v403_v20 = vsel %vm184_vm2, %v386_v12, 0.0 }
  0x99   :  { %871 = vst.msk [vmem:[%s1683_s2 + $0x8] sm:$0xff] %vm184_vm2, %v801_v15  ;;  %v887_v21 = vsel %vm184_vm2, %v801_v15, 0.0  ;;  %v189_v22 = vadd.f32 %v188_v19, %v187_v57  ;;  %v404_v24 = vadd.f32 %v403_v20, %v402_v58 }
  0x9a   :  { %v888_v25 = vadd.f32 %v887_v21, %v886_v13  ;;  %v533_v26 = vpop.f32.mrf.mxu2  ;;  %v749_v27 = vpop.f32.mrf.mxu3 }
  0x9b   :  { %v570_v28 = vmax.f32 %v533_v26, 0.0  ;;  %v786_v29 = vmax.f32 %v749_v27, 0.0  ;;  %v119_v30 = vpop.f32.mrf.mxu0  ;;  %v319_v31 = vpop.f32.mrf.mxu1 }
  0x9c   :  { %v155_v32 = vmax.f32 %v119_v30, 0.0  ;;  %v355_v33 = vmax.f32 %v319_v31, 0.0 }
  0x9d   :  { %v586_v34 = vadd.f32 %v570_v28, %v370_v23  ;;  %v602_v35 = vmul.f32 %v570_v28, %v570_v28  ;;  %v818_v36 = vmul.f32 %v786_v29, %v786_v29 }
  0x9e   :  { %v171_v37 = vmul.f32 %v155_v32, %v155_v32  ;;  %v387_v38 = vmul.f32 %v355_v33, %v355_v33  ;;  %v371_v52 = vadd.f32 %v355_v33, %v155_v32 }
  0x9f   :  { %v619_v39 = vsel %vm184_vm2, %v602_v35, 0.0  ;;  %v802_v40 = vadd.f32 %v786_v29, %v586_v34  ;;  %v835_v41 = vsel %vm184_vm2, %v818_v36, 0.0 }
  0xa0   :  { %v620_v42 = vadd.f32 %v619_v39, %v618_v17  ;;  %v836_v43 = vadd.f32 %v835_v41, %v834_v18  ;;  %v190_v44 = vsel %vm184_vm2, %v171_v37, 0.0  ;;  %v405_v45 = vsel %vm184_vm2, %v387_v38, 0.0 }
  0xa1   :  { %872 = vst.msk [vmem:[%s1683_s2 + $0x10] sm:$0xff] %vm184_vm2, %v802_v40  ;;  %v889_v46 = vsel %vm184_vm2, %v802_v40, 0.0  ;;  %v191_v47 = vadd.f32 %v190_v44, %v189_v22  ;;  %v406_v48 = vadd.f32 %v405_v45, %v404_v24 }
  0xa2   :  { %v890_v49 = vadd.f32 %v889_v46, %v888_v25  ;;  %v535_v50 = vpop.f32.mrf.mxu2  ;;  %v751_v51 = vpop.f32.mrf.mxu3 }
  0xa3   :  { %v571_v53 = vmax.f32 %v535_v50, 0.0  ;;  %v787_v54 = vmax.f32 %v751_v51, 0.0  ;;  %v122_v55 = vpop.f32.mrf.mxu0  ;;  %v322_v56 = vpop.f32.mrf.mxu1 }
  0xa4   :  { %v156_v57 = vmax.f32 %v122_v55, 0.0  ;;  %v356_v58 = vmax.f32 %v322_v56, 0.0 }
  0xa5   :  { %v587_v59 = vadd.f32 %v571_v53, %v371_v52  ;;  %v603_v60 = vmul.f32 %v571_v53, %v571_v53  ;;  %v819_v61 = vmul.f32 %v787_v54, %v787_v54 }
  0xa6   :  { %v172_v62 = vmul.f32 %v156_v57, %v156_v57  ;;  %v388_v63 = vmul.f32 %v356_v58, %v356_v58  ;;  %v372_v9 = vadd.f32 %v356_v58, %v156_v57 }
  0xa7   :  { %v621_v0 = vsel %vm184_vm2, %v603_v60, 0.0  ;;  %v803_v1 = vadd.f32 %v787_v54, %v587_v59  ;;  %v837_v2 = vsel %vm184_vm2, %v819_v61, 0.0 }
  0xa8   :  { %v622_v3 = vadd.f32 %v621_v0, %v620_v42  ;;  %v838_v4 = vadd.f32 %v837_v2, %v836_v43  ;;  %v192_v5 = vsel %vm184_vm2, %v172_v62, 0.0  ;;  %v407_v6 = vsel %vm184_vm2, %v388_v63, 0.0 }
  0xa9   :  { %873 = vst.msk [vmem:[%s1683_s2 + $0x18] sm:$0xff] %vm184_vm2, %v803_v1  ;;  %v891_v7 = vsel %vm184_vm2, %v803_v1, 0.0  ;;  %v1452_v8 = vadd.f32 %v192_v5, %v191_v47  ;;  %v1454_v10 = vadd.f32 %v407_v6, %v406_v48 }
  0xaa   :  { %v892_v11 = vadd.f32 %v891_v7, %v890_v49  ;;  %v538_v12 = vpop.f32.mrf.mxu2  ;;  %v754_v13 = vpop.f32.mrf.mxu3 }
  0xab   :  { %v572_v14 = vmax.f32 %v538_v12, 0.0  ;;  %v788_v15 = vmax.f32 %v754_v13, 0.0  ;;  %v124_v16 = vpop.f32.mrf.mxu0  ;;  %v324_v17 = vpop.f32.mrf.mxu1 }
  0xac   :  { %v157_v21 = vmax.f32 %v124_v16, 0.0  ;;  %v357_v25 = vmax.f32 %v324_v17, 0.0 }
  0xad   :  { %v588_v18 = vadd.f32 %v572_v14, %v372_v9  ;;  %v604_v19 = vmul.f32 %v572_v14, %v572_v14  ;;  %v820_v20 = vmul.f32 %v788_v15, %v788_v15 }
  0xae   :  { %v373_v32 = vadd.f32 %v357_v25, %v157_v21  ;;  %v173_v12 = vmul.f32 %v157_v21, %v157_v21  ;;  %v389_v13 = vmul.f32 %v357_v25, %v357_v25 }
  0xaf   :  { %v623_v22 = vsel %vm184_vm2, %v604_v19, 0.0  ;;  %v804_v23 = vadd.f32 %v788_v15, %v588_v18  ;;  %v839_v24 = vsel %vm184_vm2, %v820_v20, 0.0 }
  0xb0   :  { %v1458_v26 = vadd.f32 %v623_v22, %v622_v3  ;;  %v1460_v27 = vadd.f32 %v839_v24, %v838_v4  ;;  %v194_v24 = vsel %vm184_vm2, %v173_v12, 0.0 }
  0xb1   :  { %874 = vst.msk [vmem:[%s1683_s2 + $0x20] sm:$0xff] %vm184_vm2, %v804_v23  ;;  %v893_v28 = vsel %vm184_vm2, %v804_v23, 0.0 }
  0xb2   :  { %v1467_v29 = vadd.f32 %v893_v28, %v892_v11  ;;  %v540_v30 = vpop.f32.mrf.mxu2  ;;  %v756_v31 = vpop.f32.mrf.mxu3  ;;  %v409_v28 = vsel %vm184_vm2, %v389_v13, 0.0 }
  0xb3   :  { %v573_v33 = vmax.f32 %v540_v30, 0.0  ;;  %v127_v34 = vpop.f32.mrf.mxu0  ;;  %v327_v35 = vpop.f32.mrf.mxu1  ;;  %v789_v37 = vmax.f32 %v756_v31, 0.0 }
  0xb4   :  { %v158_v39 = vmax.f32 %v127_v34, 0.0  ;;  %v358_v40 = vmax.f32 %v327_v35, 0.0 }
  0xb5   :  { %v589_v36 = vadd.f32 %v573_v33, %v373_v32  ;;  %v605_v20 = vmul.f32 %v573_v33, %v573_v33  ;;  %v821_v21 = vmul.f32 %v789_v37, %v789_v37 }
  0xb6   :  { %v374_v41 = vadd.f32 %v358_v40, %v158_v39  ;;  %v174_v25 = vmul.f32 %v158_v39, %v158_v39  ;;  %v390_v33 = vmul.f32 %v358_v40, %v358_v40  ;;  %v410_v39 = vadd.f32 %v409_v28, %v1454_v10 }
  0xb7   :  { %v1469_v38 = vadd.f32 %v789_v37, %v589_v36  ;;  %v625_v34 = vsel %vm184_vm2, %v605_v20, 0.0  ;;  %v195_v37 = vadd.f32 %v194_v24, %v1452_v8 }
  0xb8   :  { %v626_v40 = vadd.f32 %v625_v34, %v1458_v26  ;;  %v411_v8 = vsel %vm184_vm2, %v390_v33, 0.0 }
  0xb9   :  { %875 = vst.msk [vmem:[%s1683_s2 + $0x28] sm:$0xff] %vm184_vm2, %v1469_v38 }
  0xba   :  { %v543_v42 = vpop.f32.mrf.mxu2  ;;  %v759_v43 = vpop.f32.mrf.mxu3 }
  0xbb   :  { %v574_v44 = vmax.f32 %v543_v42, 0.0  ;;  %v129_v45 = vpop.f32.mrf.mxu0  ;;  %v329_v46 = vpop.f32.mrf.mxu1  ;;  %v790_v48 = vmax.f32 %v759_v43, 0.0 }
  0xbc   :  { %v159_v50 = vmax.f32 %v129_v45, 0.0  ;;  %v1478_v51 = vmax.f32 %v329_v46, 0.0  ;;  %v196_v46 = vsel %vm184_vm2, %v174_v25, 0.0 }
  0xbd   :  { %v590_v47 = vadd.f32 %v574_v44, %v374_v41  ;;  %v606_v35 = vmul.f32 %v574_v44, %v574_v44  ;;  %v822_v41 = vmul.f32 %v790_v48, %v790_v48  ;;  %v841_v44 = vsel %vm184_vm2, %v821_v21, 0.0 }
  0xbe   :  { %v375_v54 = vadd.f32 %v1478_v51, %v159_v50  ;;  %v175_v42 = vmul.f32 %v159_v50, %v159_v50 }
  0xbf   :  { %v1476_v49 = vadd.f32 %v790_v48, %v590_v47  ;;  %v627_v10 = vsel %vm184_vm2, %v606_v35, 0.0  ;;  %v391_v48 = vmul.f32 %v1478_v51, %v1478_v51 }
  0xc1   :  { %876 = vst.msk [vmem:[%s1683_s2 + $0x30] sm:$0xff] %vm184_vm2, %v1476_v49  ;;  %v413_v12 = vsel %vm184_vm2, %v391_v48, 0.0 }
  0xc2   :  { %v545_v52 = vpop.f32.mrf.mxu2  ;;  %v761_v53 = vpop.f32.mrf.mxu3 }
  0xc3   :  { %v575_v55 = vmax.f32 %v545_v52, 0.0  ;;  %v132_v56 = vpop.f32.mrf.mxu0  ;;  %v332_v57 = vpop.f32.mrf.mxu1  ;;  %v791_v59 = vmax.f32 %v761_v53, 0.0 }
  0xc4   :  { %v160_v61 = vmax.f32 %v132_v56, 0.0  ;;  %v1488_v62 = vmax.f32 %v332_v57, 0.0 }
  0xc5   :  { %v591_v58 = vadd.f32 %v575_v55, %v375_v54  ;;  %v895_v54 = vsel %vm184_vm2, %v1469_v38, 0.0  ;;  %v607_v50 = vmul.f32 %v575_v55, %v575_v55  ;;  %v823_v26 = vmul.f32 %v791_v59, %v791_v59 }
  0xc6   :  { %v376_v63 = vadd.f32 %v1488_v62, %v160_v61  ;;  %v198_v38 = vsel %vm184_vm2, %v175_v42, 0.0  ;;  %v896_v55 = vadd.f32 %v895_v54, %v1467_v29 }
  0xc7   :  { %v1486_v60 = vadd.f32 %v791_v59, %v591_v58  ;;  %v842_v58 = vadd.f32 %v841_v44, %v1460_v27  ;;  %v412_v59 = vadd.f32 %v411_v8, %v410_v39  ;;  %v897_v27 = vsel %vm184_vm2, %v1476_v49, 0.0 }
  0xc8   :  { %v629_v13 = vsel %vm184_vm2, %v607_v50, 0.0  ;;  %v898_v25 = vadd.f32 %v897_v27, %v896_v55 }
  0xc9   :  { %877 = vst.msk [vmem:[%s1683_s2 + $0x38] sm:$0xff] %vm184_vm2, %v1486_v60  ;;  %v414_v20 = vadd.f32 %v413_v12, %v412_v59  ;;  %v899_v39 = vsel %vm184_vm2, %v1486_v60, 0.0 }
  0xca   :  { %v548_v0 = vpop.f32.mrf.mxu2  ;;  %v764_v1 = vpop.f32.mrf.mxu3 }
  0xcb   :  { %v1496_v2 = vmax.f32 %v548_v0, 0.0  ;;  %v134_v3 = vpop.f32.mrf.mxu0  ;;  %v334_v4 = vpop.f32.mrf.mxu1  ;;  %v1499_v6 = vmax.f32 %v764_v1, 0.0  ;;  %v843_v0 = vsel %vm184_vm2, %v822_v41, 0.0  ;;  %v176_v1 = vmul.f32 %v160_v61, %v160_v61 }
  0xcc   :  { %v1504_v9 = vmax.f32 %v134_v3, 0.0  ;;  %v1506_v11 = vmax.f32 %v334_v4, 0.0  ;;  %v845_v61 = vsel %vm184_vm2, %v823_v26, 0.0  ;;  %v844_v29 = vadd.f32 %v843_v0, %v842_v58 }
  0xcd   :  { %v592_v5 = vadd.f32 %v1496_v2, %v376_v63  ;;  %v197_v63 = vadd.f32 %v196_v46, %v195_v37  ;;  %v824_v49 = vmul.f32 %v1499_v6, %v1499_v6 }
  0xce   :  { %v377_v16 = vadd.f32 %v1506_v11, %v1504_v9  ;;  %v846_v33 = vadd.f32 %v845_v61, %v844_v29 }
  0xcf   :  { %v1502_v7 = vadd.f32 %v1499_v6, %v592_v5  ;;  %v628_v5 = vadd.f32 %v627_v10, %v626_v40  ;;  %v393_v6 = vmul.f32 %v1506_v11, %v1506_v11  ;;  %v900_v10 = vadd.f32 %v899_v39, %v898_v25 }
  0xd1   :  { %878 = vst.msk [vmem:[%s1683_s2 + $0x40] sm:$0xff] %vm184_vm2, %v1502_v7  ;;  %v630_v34 = vadd.f32 %v629_v13, %v628_v5  ;;  %v417_v54 = vsel %vm184_vm2, %v393_v6, 0.0 }
  0xd2   :  { %v550_v14 = vpop.f32.mrf.mxu2  ;;  %v766_v15 = vpop.f32.mrf.mxu3 }
  0xd3   :  { %v1515_v17 = vmax.f32 %v550_v14, 0.0  ;;  %v137_v18 = vpop.f32.mrf.mxu0  ;;  %v337_v19 = vpop.f32.mrf.mxu1  ;;  %v1518_v23 = vmax.f32 %v766_v15, 0.0  ;;  %v392_v14 = vmul.f32 %v1488_v62, %v1488_v62  ;;  %v199_v15 = vadd.f32 %v198_v38, %v197_v63 }
  0xd4   :  { %v1525_v31 = vmax.f32 %v137_v18, 0.0  ;;  %v1527_v32 = vmax.f32 %v337_v19, 0.0 }
  0xd5   :  { %v593_v22 = vadd.f32 %v1515_v17, %v377_v16  ;;  %v608_v16 = vmul.f32 %v1496_v2, %v1496_v2  ;;  %v177_v2 = vmul.f32 %v1504_v9, %v1504_v9  ;;  %v415_v35 = vsel %vm184_vm2, %v392_v14, 0.0 }
  0xd6   :  { %v378_v36 = vadd.f32 %v1527_v32, %v1525_v31  ;;  %v416_v46 = vadd.f32 %v415_v35, %v414_v20  ;;  %v178_v60 = vmul.f32 %v1525_v31, %v1525_v31 }
  0xd7   :  { %v1523_v30 = vadd.f32 %v1518_v23, %v593_v22  ;;  %v200_v22 = vsel %vm184_vm2, %v176_v1, 0.0  ;;  %v631_v42 = vsel %vm184_vm2, %v608_v16, 0.0  ;;  %v202_v11 = vsel %vm184_vm2, %v177_v2, 0.0 }
  0xd8   :  { %v201_v41 = vadd.f32 %v200_v22, %v199_v15  ;;  %v418_v1 = vadd.f32 %v417_v54, %v416_v46  ;;  %v204_v59 = vsel %vm184_vm2, %v178_v60, 0.0 }
  0xd9   :  { %879 = vst.msk [vmem:[%s1683_s2 + $0x48] sm:$0xff] %vm184_vm2, %v1523_v30 }
  0xda   :  { %v553_v43 = vpop.f32.mrf.mxu2  ;;  %v769_v45 = vpop.f32.mrf.mxu3  ;;  %v203_v26 = vadd.f32 %v202_v11, %v201_v41 }
  0xdb   :  { %v1542_v47 = vmax.f32 %v553_v43, 0.0  ;;  %v139_v52 = vpop.f32.mrf.mxu0  ;;  %v339_v53 = vpop.f32.mrf.mxu1  ;;  %v1551_v57 = vmax.f32 %v769_v45, 0.0  ;;  %v847_v43 = vsel %vm184_vm2, %v824_v49, 0.0  ;;  %v609_v45 = vmul.f32 %v1515_v17, %v1515_v17 }
  0xdc   :  { %v1559_v4 = vmax.f32 %v139_v52, 0.0  ;;  %v1561_v51 = vmax.f32 %v339_v53, 0.0  ;;  %v825_v52 = vmul.f32 %v1518_v23, %v1518_v23  ;;  %v901_v53 = vsel %vm184_vm2, %v1502_v7, 0.0 }
  0xdd   :  { %v594_v56 = vadd.f32 %v1542_v47, %v378_v36  ;;  %v394_v17 = vmul.f32 %v1527_v32, %v1527_v32  ;;  %v632_v23 = vadd.f32 %v631_v42, %v630_v34  ;;  %v848_v48 = vadd.f32 %v847_v43, %v846_v33 }
  0xde   :  { %v379_v62 = vadd.f32 %v1561_v51, %v1559_v4  ;;  %v610_v31 = vmul.f32 %v1542_v47, %v1542_v47  ;;  %v826_v32 = vmul.f32 %v1551_v57, %v1551_v57  ;;  %v902_v38 = vadd.f32 %v901_v53, %v900_v10 }
  0xdf   :  { %v1557_v3 = vadd.f32 %v1551_v57, %v594_v56  ;;  %v633_v56 = vsel %vm184_vm2, %v609_v45, 0.0  ;;  %v849_v55 = vsel %vm184_vm2, %v825_v52, 0.0  ;;  %v419_v5 = vsel %vm184_vm2, %v394_v17, 0.0 }
  0xe0   :  { %v179_v47 = vmul.f32 %v1559_v4, %v1559_v4  ;;  %v634_v13 = vadd.f32 %v633_v56, %v632_v23  ;;  %v903_v57 = vsel %vm184_vm2, %v1523_v30, 0.0  ;;  %v635_v61 = vsel %vm184_vm2, %v610_v31, 0.0 }
  0xe1   :  { %880 = vst.msk [vmem:[%s1683_s2 + $0x50] sm:$0xff] %vm184_vm2, %v1557_v3  ;;  %v395_v14 = vmul.f32 %v1561_v51, %v1561_v51  ;;  %v851_v29 = vsel %vm184_vm2, %v826_v32, 0.0  ;;  %v420_v4 = vadd.f32 %v419_v5, %v418_v1  ;;  %v904_v20 = vadd.f32 %v903_v57, %v902_v38 }
  0xe2   :  { %v555_v18 = vpop.f32.mrf.mxu2  ;;  %v771_v19 = vpop.f32.mrf.mxu3  ;;  %v636_v22 = vadd.f32 %v635_v61, %v634_v13  ;;  %v905_v2 = vsel %vm184_vm2, %v1557_v3, 0.0 }
  0xe3   :  { %v579_v24 = vmax.f32 %v555_v18, 0.0  ;;  %v142_v28 = vpop.f32.mrf.mxu0  ;;  %v342_v21 = vpop.f32.mrf.mxu1  ;;  %v795_v37 = vmax.f32 %v771_v19, 0.0  ;;  %v850_v18 = vadd.f32 %v849_v55, %v848_v48  ;;  %v205_v19 = vadd.f32 %v204_v59, %v203_v26 }
  0xe4   :  { %v164_v9 = vmax.f32 %v142_v28, 0.0  ;;  %v364_v44 = vmax.f32 %v342_v21, 0.0  ;;  %v421_v51 = vsel %vm184_vm2, %v395_v14, 0.0  ;;  %v906_v10 = vadd.f32 %v905_v2, %v904_v20 }
  0xe5   :  { %v595_v36 = vadd.f32 %v579_v24, %v379_v62  ;;  %v206_v62 = vsel %vm184_vm2, %v179_v47, 0.0  ;;  %v611_v28 = vmul.f32 %v579_v24, %v579_v24  ;;  %v852_v30 = vadd.f32 %v851_v29, %v850_v18 }
  0xe6   :  { %v380_v8 = vadd.f32 %v364_v44, %v164_v9  ;;  %v827_v21 = vmul.f32 %v795_v37, %v795_v37  ;;  %v180_v25 = vmul.f32 %v164_v9, %v164_v9  ;;  %v396_v35 = vmul.f32 %v364_v44, %v364_v44 }
  0xe7   :  { %v1594_v40 = vadd.f32 %v795_v37, %v595_v36  ;;  %v207_v41 = vadd.f32 %v206_v62, %v205_v19  ;;  %v422_v46 = vadd.f32 %v421_v51, %v420_v4  ;;  %v637_v11 = vsel %vm184_vm2, %v611_v28, 0.0 }
  0xe8   :  { %v853_v9 = vsel %vm184_vm2, %v827_v21, 0.0  ;;  %v208_v60 = vsel %vm184_vm2, %v180_v25, 0.0  ;;  %v423_v54 = vsel %vm184_vm2, %v396_v35, 0.0 }
  0xe9   :  { %881 = vst.msk [vmem:[%s1683_s2 + $0x58] sm:$0xff] %vm184_vm2, %v1594_v40  ;;  %v907_v44 = vsel %vm184_vm2, %v1594_v40, 0.0  ;;  %v209_v26 = vadd.f32 %v208_v60, %v207_v41  ;;  %v424_v40 = vadd.f32 %v423_v54, %v422_v46 }
  0xea   :  { %v558_v50 = vpop.f32.mrf.mxu2  ;;  %v774_v7 = vpop.f32.mrf.mxu3  ;;  %v908_v32 = vadd.f32 %v907_v44, %v906_v10 }
  0xeb   :  { %v580_v58 = vmax.f32 %v558_v50, 0.0  ;;  %v144_v63 = vpop.f32.mrf.mxu0  ;;  %v344_v0 = vpop.f32.mrf.mxu1  ;;  %v796_v27 = vmax.f32 %v774_v7, 0.0  ;;  %v638_v50 = vadd.f32 %v637_v11, %v636_v22  ;;  %v854_v7 = vadd.f32 %v853_v9, %v852_v30 }
  0xec   :  { %v165_v16 = vmax.f32 %v144_v63, 0.0  ;;  %v365_v49 = vmax.f32 %v344_v0, 0.0 }
  0xed   :  { %v596_v12 = vadd.f32 %v580_v58, %v380_v8  ;;  %v612_v53 = vmul.f32 %v580_v58, %v580_v58  ;;  %v828_v17 = vmul.f32 %v796_v27, %v796_v27 }
  0xee   :  { %v381_v6 = vadd.f32 %v365_v49, %v165_v16  ;;  %v181_v42 = vmul.f32 %v165_v16, %v165_v16  ;;  %v397_v3 = vmul.f32 %v365_v49, %v365_v49 }
  0xef   :  { %v1627_v15 = vadd.f32 %v796_v27, %v596_v12  ;;  %v639_v58 = vsel %vm184_vm2, %v612_v53, 0.0  ;;  %v855_v1 = vsel %vm184_vm2, %v828_v17, 0.0 }
  0xf0   :  { %v210_v23 = vsel %vm184_vm2, %v181_v42, 0.0  ;;  %v425_v63 = vsel %vm184_vm2, %v397_v3, 0.0  ;;  %v640_v22 = vadd.f32 %v639_v58, %v638_v50  ;;  %v856_v51 = vadd.f32 %v855_v1, %v854_v7 }
  0xf1   :  { %882 = vst.msk [vmem:[%s1683_s2 + $0x60] sm:$0xff] %vm184_vm2, %v1627_v15  ;;  %v211_v55 = vadd.f32 %v210_v23, %v209_v26  ;;  %v426_v14 = vadd.f32 %v425_v63, %v424_v40  ;;  %v909_v21 = vsel %vm184_vm2, %v1627_v15, 0.0 }
  0xf2   :  { %v560_v34 = vpop.f32.mrf.mxu2  ;;  %v776_v33 = vpop.f32.mrf.mxu3 }
  0xf3   :  { %v581_v36 = vmax.f32 %v560_v34, 0.0  ;;  %v147_v24 = vpop.f32.mrf.mxu0  ;;  %v347_v39 = vpop.f32.mrf.mxu1  ;;  %v797_v37 = vmax.f32 %v776_v33, 0.0 }
  0xf4   :  { %v166_v43 = vmax.f32 %v147_v24, 0.0  ;;  %v366_v45 = vmax.f32 %v347_v39, 0.0 }
  0xf5   :  { %v597_v52 = vadd.f32 %v581_v36, %v381_v6  ;;  %v613_v29 = vmul.f32 %v581_v36, %v581_v36  ;;  %v829_v16 = vmul.f32 %v797_v37, %v797_v37 }
  0xf6   :  { %v182_v48 = vmul.f32 %v166_v43, %v166_v43  ;;  %v398_v31 = vmul.f32 %v366_v45, %v366_v45  ;;  %v382_v56 = vadd.f32 %v366_v45, %v166_v43 }
  0xf7   :  { %v813_v8 = vadd.f32 %v797_v37, %v597_v52  ;;  %v641_v33 = vsel %vm184_vm2, %v613_v29, 0.0  ;;  %v857_v2 = vsel %vm184_vm2, %v829_v16, 0.0  ;;  %v910_v52 = vadd.f32 %v909_v21, %v908_v32 }
  0xf8   :  { %v212_v27 = vsel %vm184_vm2, %v182_v48, 0.0  ;;  %v427_v13 = vsel %vm184_vm2, %v398_v31, 0.0  ;;  %v642_v37 = vadd.f32 %v641_v33, %v640_v22  ;;  %v858_v9 = vadd.f32 %v857_v2, %v856_v51 }
  0xf9   :  { %883 = vst.msk [vmem:[%s1683_s2 + $0x68] sm:$0xff] %vm184_vm2, %v813_v8  ;;  %v213_v62 = vadd.f32 %v212_v27, %v211_v55  ;;  %v428_v28 = vadd.f32 %v427_v13, %v426_v14  ;;  %v911_v36 = vsel %vm184_vm2, %v813_v8, 0.0 }
  0xfa   :  { %v563_v0 = vpop.f32.mrf.mxu2  ;;  %v779_v38 = vpop.f32.mrf.mxu3  ;;  %v912_v17 = vadd.f32 %v911_v36, %v910_v52 }
  0xfb   :  { %v582_v59 = vmax.f32 %v563_v0, 0.0  ;;  %v798_v5 = vmax.f32 %v779_v38, 0.0  ;;  %v149_v47 = vpop.f32.mrf.mxu0  ;;  %v349_v12 = vpop.f32.mrf.mxu1 }
  0xfc   :  { %v167_v57 = vmax.f32 %v149_v47, 0.0  ;;  %v367_v61 = vmax.f32 %v349_v12, 0.0 }
  0xfd   :  { %v598_v49 = vadd.f32 %v582_v59, %v382_v56  ;;  %v614_v18 = vmul.f32 %v582_v59, %v582_v59  ;;  %v830_v19 = vmul.f32 %v798_v5, %v798_v5 }
  0xfe   :  { %v183_v4 = vmul.f32 %v167_v57, %v167_v57  ;;  %v399_v20 = vmul.f32 %v367_v61, %v367_v61  ;;  %v383_v39 = vadd.f32 %v367_v61, %v167_v57 }
  0xff   :  { %v814_v30 = vadd.f32 %v798_v5, %v598_v49  ;;  %v643_v24 = vsel %vm184_vm2, %v614_v18, 0.0  ;;  %v859_v15 = vsel %vm184_vm2, %v830_v19, 0.0 }
 0x100   :  { %v214_v25 = vsel %vm184_vm2, %v183_v4, 0.0  ;;  %v429_v34 = vsel %vm184_vm2, %v399_v20, 0.0  ;;  %v644_v8 = vadd.f32 %v643_v24, %v642_v37  ;;  %v860_v10 = vadd.f32 %v859_v15, %v858_v9 }
 0x101   :  { %884 = vst.msk [vmem:[%s1683_s2 + $0x70] sm:$0xff] %vm184_vm2, %v814_v30  ;;  %v215_v35 = vadd.f32 %v214_v25, %v213_v62  ;;  %v430_v6 = vadd.f32 %v429_v34, %v428_v28  ;;  %v913_v60 = vsel %vm184_vm2, %v814_v30, 0.0 }
 0x102   :  { %v565_v41 = vpop.f32.mrf.mxu2  ;;  %v781_v42 = vpop.f32.mrf.mxu3  ;;  %v914_v26 = vadd.f32 %v913_v60, %v912_v17 }
 0x103   :  { %v216_v43 = vrot.slane %v215_v35, 4  ;;  %v431_v45 = vrot.slane %v430_v6, 4  ;;  %v583_v46 = vmax.f32 %v565_v41, 0.0  ;;  %v799_v11 = vmax.f32 %v781_v42, 0.0 }
 0x105   :  { %v217_v53 = vadd.f32 %v216_v43, %v215_v35  ;;  %v432_v3 = vadd.f32 %v431_v45, %v430_v6  ;;  %v599_v44 = vadd.f32 %v583_v46, %v383_v39  ;;  %v615_v54 = vmul.f32 %v583_v46, %v583_v46 }
 0x106   :  { %v831_v23 = vmul.f32 %v799_v11, %v799_v11 }
 0x107   :  { %v218_v48 = vrot.slane %v217_v53, 2  ;;  %v433_v31 = vrot.slane %v432_v3, 2  ;;  %v645_v50 = vsel %vm184_vm2, %v615_v54, 0.0  ;;  %v815_v7 = vadd.f32 %v799_v11, %v599_v44 }
 0x108   :  { %v646_v56 = vadd.f32 %v645_v50, %v644_v8  ;;  %v861_v32 = vsel %vm184_vm2, %v831_v23, 0.0 }
 0x109   :  { %v219_v40 = vadd.f32 %v218_v48, %v217_v53  ;;  %v434_v58 = vadd.f32 %v433_v31, %v432_v3  ;;  %v862_v63 = vadd.f32 %v861_v32, %v860_v10  ;;  %885 = vst.msk [vmem:[%s1683_s2 + $0x78] sm:$0xff] %vm184_vm2, %v815_v7  ;;  %v915_v0 = vsel %vm184_vm2, %v815_v7, 0.0  ;;  %s1256_s2 = smov [#allocation2]  }
 0x10a   :  { %v647_v38 = vrot.slane %v646_v56, 4  ;;  %v916_v1 = vadd.f32 %v915_v0, %v914_v26  ;;  %s933_s29 = sshll.u32 %s1256_s2, 4  ;;  %s934_s29 = int_to_ptr.vmem [resolvable:$true] %s933_s29 }
 0x10b   :  { %v220_v55 = vrot.slane %v219_v40, 1  ;;  %v435_v59 = vrot.slane %v434_v58, 1  ;;  %v863_v5 = vrot.slane %v862_v63, 4 }
 0x10c   :  { %v648_v47 = vadd.f32 %v647_v38, %v646_v56  ;;  %v917_v12 = vrot.slane %v916_v1, 4 }
 0x10d   :  { %v221_v27 = vadd.f32 %v220_v55, %v219_v40  ;;  %v436_v13 = vadd.f32 %v435_v59, %v434_v58  ;;  %v864_v57 = vadd.f32 %v863_v5, %v862_v63 }
 0x10e   :  { %v649_v61 = vrot.slane %v648_v47, 2  ;;  %v918_v14 = vadd.f32 %v917_v12, %v916_v1 }
 0x10f   :  { %v865_v29 = vrot.slane %v864_v57, 2  ;;  %v437_v16 = vadd.f32 %v436_v13, %v221_v27 }
 0x110   :  { %v650_v49 = vadd.f32 %v649_v61, %v648_v47  ;;  %v919_v18 = vrot.slane %v918_v14, 2 }
 0x111   :  { %v866_v19 = vadd.f32 %v865_v29, %v864_v57 }
 0x112   :  { %v651_v4 = vrot.slane %v650_v49, 1  ;;  %v920_v20 = vadd.f32 %v919_v18, %v918_v14 }
 0x113   :  { %v867_v22 = vrot.slane %v866_v19, 1 }
 0x114   :  { %v921_v62 = vrot.slane %v920_v20, 1  ;;  %v652_v28 = vadd.f32 %v651_v4, %v650_v49 }
 0x115   :  { %v868_v21 = vadd.f32 %v867_v22, %v866_v19 }
 0x116   :  { %v922_v30 = vadd.f32 %v921_v62, %v920_v20  ;;  %v653_v51 = vadd.f32 %v652_v28, %v437_v16 }
 0x118   :  { %924 = vst.msk [vmem:[#allocation2] sm:$0x1] %vm923_vm3, %v922_v30  ;;  %v869_v25 = vadd.f32 %v868_v21, %v653_v51 }
 0x119   :  { %938 = dma.vmem_to_hbm [thread:$0]  %s934_s29, 16, %s936_s6, [#allocation3]  }
 0x11a   :  { %925 = vst.msk [vmem:[#allocation4] sm:$0x1] %vm923_vm3, %v869_v25 }
 0x11b   :  { %949 = dma.vmem_to_hbm [thread:$0]  %s945_s8, 16, %s947_s11, [#allocation5]  }
 0x11c   :  { %1252 = dma.done.wait [#allocation3], 16  }
 0x11d   :  { %1253 = vsyncadd [#allocation3], 4294967280 }
 0x11e   :  { %1254 = dma.done.wait [#allocation5], 16  }
 0x11f   :  { %1255 = vsyncadd [#allocation5], 4294967280 }
 0x120   :  { %960 = vsyncpa [#allocation3], 1 }
 0x121   :  { %961 = vsyncpa [#allocation5], 1 }

</bundles_post_ra>
